<compile_context>
chip_gen: v6e
topology: v6e:2x2x1
jax: 0.10.0
libtpu: 0.0.40
codegen_flags: <defaults>
</compile_context>

<pallas_src>
import functools

import jax
import jax.numpy as jnp
import numpy as np
from jax.experimental import pallas as pl
from jax.experimental.pallas import tpu as pltpu


def _round_up(x, m):
    return (x + m - 1) // m * m


def _conv_gemm_kernel(p_ref, w_ref, b_ref, o_ref):
    """One im2col-GEMM tile per grid step.

    p_ref : (tm, K)   im2col patch rows, K = kh*kw*Cin
    w_ref : (K, Cp)   flattened filter, Cout zero-padded to 128 lanes
    b_ref : (1, Cp)   bias, zero-padded to 128 lanes
    o_ref : (tm, Cp)  lane-dense output tile
    Single MXU contraction + f32 bias epilogue.
    """
    acc = jnp.dot(p_ref[...], w_ref[...], preferred_element_type=jnp.float32)
    acc = acc + b_ref[...].astype(jnp.float32)
    o_ref[...] = acc.astype(o_ref.dtype)


def conv_bn_act(x_nchw, weight_oihw, bias, *, stride=1, padding=0):
    """ConvBnActModule forward (norm/act are Identity for default args)."""
    # TODO(synk): SeparableConv2d branch (use_separable_conv=True and stride>1)
    #             not implemented; default module config uses the plain Conv2d path.
    n, cin, h, w = x_nchw.shape
    cout, cin_w, kh, kw = weight_oihw.shape
    assert cin_w == cin, "grouped conv not supported"

    # --- wrapper-side layout prep (NCHW -> NHWC, pad, im2col) -------------
    x = jnp.transpose(x_nchw, (0, 2, 3, 1))                      # (N, H, W, Cin)
    x = jnp.pad(x, ((0, 0), (padding, padding), (padding, padding), (0, 0)))
    hp, wp = h + 2 * padding, w + 2 * padding
    ho = (hp - kh) // stride + 1
    wo = (wp - kw) // stride + 1

    # im2col: (N, Ho, Wo, kh*kw*Cin) -> (M, K), ordered [i, j, cin] to match
    # the (kh, kw, Cin, Cout) weight flattening below.
    taps = []
    for i in range(kh):
        for j in range(kw):
            taps.append(x[:, i:i + (ho - 1) * stride + 1:stride,
                          j:j + (wo - 1) * stride + 1:stride, :])
    patches = jnp.concatenate(taps, axis=-1)                     # (N, Ho, Wo, K)
    k_dim = kh * kw * cin
    m_total = n * ho * wo
    patches = patches.reshape(m_total, k_dim)

    # Lane-dense output: pad Cout up to a multiple of 128 lanes.
    cp = _round_up(cout, 128)
    w_mat = jnp.transpose(weight_oihw, (2, 3, 1, 0)).reshape(k_dim, cout)
    w_mat = jnp.pad(w_mat, ((0, 0), (0, cp - cout)))             # (K, Cp)
    b_mat = jnp.pad(bias.reshape(1, cout), ((0, 0), (0, cp - cout)))  # (1, Cp)

    # Tile M; keep >=2 grid steps when possible (v7x: 2 TensorCores).
    tm = min(256, _round_up(m_total, 8))
    m_pad = _round_up(m_total, tm)
    if m_pad != m_total:
        patches = jnp.pad(patches, ((0, m_pad - m_total), (0, 0)))
    grid_m = m_pad // tm

    out2d = pl.pallas_call(
        _conv_gemm_kernel,
        out_shape=jax.ShapeDtypeStruct((m_pad, cp), x.dtype),
        grid_spec=pltpu.PrefetchScalarGridSpec(
            num_scalar_prefetch=0,
            grid=(grid_m,),
            in_specs=[
                pl.BlockSpec((tm, k_dim), lambda m: (m, 0)),
                pl.BlockSpec((k_dim, cp), lambda m: (0, 0)),   # VMEM-resident
                pl.BlockSpec((1, cp), lambda m: (0, 0)),       # VMEM-resident
            ],
            out_specs=pl.BlockSpec((tm, cp), lambda m: (m, 0)),
        ),
        compiler_params=pltpu.CompilerParams(
            dimension_semantics=("parallel",)),
    )(patches, w_mat, b_mat)

    # Drop row / lane padding, back to NCHW to match PyTorch convention.
    out = out2d[:m_total, :cout].reshape(n, ho, wo, cout)
    return jnp.transpose(out, (0, 3, 1, 2))


if __name__ == "__main__":
    # Module config: ConvBnActModule(in_features=4, out_features=8,
    #                                kernel_size=3, stride=1, padding=1, bias=True)
    key = jax.random.PRNGKey(0)
    kx, kw_, kb = jax.random.split(key, 3)

    N, C_IN, H, W = 2, 4, 16, 16
    C_OUT, K, PAD = 8, 3, 1

    x = jax.random.normal(kx, (N, C_IN, H, W), dtype=jnp.float32)
    # Deterministic synthetic parameters (PyTorch Conv2d weight layout OIHW).
    weight = jax.random.normal(kw_, (C_OUT, C_IN, K, K), dtype=jnp.float32) * 0.1
    bias = jax.random.normal(kb, (C_OUT,), dtype=jnp.float32) * 0.1

    out = conv_bn_act(x, weight, bias, stride=1, padding=PAD)
    out = jax.block_until_ready(out)

    # Reference (plain XLA conv) for a sanity check.
    ref = jax.lax.conv_general_dilated(
        x, weight, window_strides=(1, 1), padding=[(PAD, PAD), (PAD, PAD)],
        dimension_numbers=("NCHW", "OIHW", "NCHW")) + bias.reshape(1, -1, 1, 1)
    ref = jax.block_until_ready(ref)

    assert out.shape == (N, C_OUT, H, W), out.shape
    np.testing.assert_allclose(np.asarray(out), np.asarray(ref), atol=1e-4, rtol=1e-4)

    print("KERNEL_OK")
</pallas_src>

<mosaic_0001>
module attributes {stable_mosaic.version = 11 : i64} {
  func.func @_conv_gemm_kernel(%arg0: i32, %arg1: memref<256x36xf32, #tpu.memory_space<vmem>>, %arg2: memref<36x128xf32, #tpu.memory_space<vmem>>, %arg3: memref<1x128xf32, #tpu.memory_space<vmem>>, %arg4: memref<256x128xf32, #tpu.memory_space<vmem>>) attributes {dimension_semantics = [#tpu.dimension_semantics<parallel>], iteration_bounds = array<i64: 2>, scalar_prefetch = 0 : i64, scratch_operands = 0 : i64, tpu.core_type = #tpu.core_type<tc>, window_params = [{transform_indices = @transform_0, window_bounds = array<i64: 256, 36>}, {pipeline_mode = #tpu.pipeline_mode<synchronous>, transform_indices = @transform_1, window_bounds = array<i64: 36, 128>}, {pipeline_mode = #tpu.pipeline_mode<synchronous>, transform_indices = @transform_2, window_bounds = array<i64: 1, 128>}, {transform_indices = @transform_3, window_bounds = array<i64: 256, 128>}]} {
    %c0 = arith.constant 0 : index
    %c0_0 = arith.constant 0 : index
    %0 = vector.load %arg1[%c0, %c0_0] : memref<256x36xf32, #tpu.memory_space<vmem>>, vector<256x36xf32>
    %c0_1 = arith.constant 0 : index
    %c0_2 = arith.constant 0 : index
    %1 = vector.load %arg2[%c0_1, %c0_2] : memref<36x128xf32, #tpu.memory_space<vmem>>, vector<36x128xf32>
    %cst = arith.constant dense<0.000000e+00> : vector<256x128xf32>
    %2 = tpu.matmul %0, %1, %cst {dimension_numbers = #tpu.dot_dimension_numbers<[1], [0], [0], [1], [0, 0, 1, 1], [], []>} : vector<256x36xf32>, vector<36x128xf32>, vector<256x128xf32> -> vector<256x128xf32>
    %c0_3 = arith.constant 0 : index
    %c0_4 = arith.constant 0 : index
    %3 = vector.load %arg3[%c0_3, %c0_4] : memref<1x128xf32, #tpu.memory_space<vmem>>, vector<1x128xf32>
    %4 = vector.broadcast %3 : vector<1x128xf32> to vector<256x128xf32>
    %5 = arith.addf %2, %4 : vector<256x128xf32>
    %c0_5 = arith.constant 0 : index
    %c0_6 = arith.constant 0 : index
    %6 = vector.load %arg4[%c0_5, %c0_6] : memref<256x128xf32, #tpu.memory_space<vmem>>, vector<256x128xf32>
    tpu.vector_store %arg4[%c0_5, %c0_6], %5 {strides = array<i32>} : memref<256x128xf32, #tpu.memory_space<vmem>>, vector<256x128xf32>,
    return
  }
  func.func @transform_0(%arg0: i32) -> (i32, i32) {
    %c0_i32 = arith.constant 0 : i32
    %c0_i32_0 = arith.constant 0 : i32
    return %arg0, %c0_i32 : i32, i32
  }
  func.func @transform_1(%arg0: i32) -> (i32, i32) {
    %c0_i32 = arith.constant 0 : i32
    %c0_i32_0 = arith.constant 0 : i32
    %c0_i32_1 = arith.constant 0 : i32
    return %c0_i32, %c0_i32_0 : i32, i32
  }
  func.func @transform_2(%arg0: i32) -> (i32, i32) {
    %c0_i32 = arith.constant 0 : i32
    %c0_i32_0 = arith.constant 0 : i32
    %c0_i32_1 = arith.constant 0 : i32
    return %c0_i32, %c0_i32_0 : i32, i32
  }
  func.func @transform_3(%arg0: i32) -> (i32, i32) {
    %c0_i32 = arith.constant 0 : i32
    %c0_i32_0 = arith.constant 0 : i32
    return %arg0, %c0_i32 : i32, i32
  }
}

</mosaic_0001>

<bundles_post_ra>
// kernel: tpu_custom_call.1
= control target key start
LH: loop header
LB: loop body
LE: loop exit
PB: predicated region body
PF: predicated region fallthrough
CT: control target
= control target key end

     0   :  { %8 = vsyncpa [#allocation3], 0  ;;  %s1186_s0 = inlined_call_operand.vmem [shape: f32[512,36], index: 0, kind: input, shape index: {}]   ;;  %s1187_s1 = inlined_call_operand.vmem [shape: f32[36,128], index: 1, kind: input, shape index: {}]   ;;  %s1188_s2 = inlined_call_operand.vmem [shape: f32[1,128], index: 2, kind: input, shape index: {}]   ;;  %s1189_s3 = inlined_call_operand.hbm [shape: f32[512,128], index: 3, kind: output, shape index: {}]  }
   0x1   :  { %10 = vsyncpa [#allocation3 + $0x1], 0  ;;  %s928_s12 = smov 0   ;;  %s930_s13 = smov 0  }
   0x2   :  { %s932_s14 = smov 0   ;;  %s934_s15 = smov 0  }
   0x3 LB: > { %s949_s16 = sadd.s32 4294967295, %s903_s15   ;;  %s650_s17 = sadd.s32 4294967294, %s903_s15   ;;  %s903_s15 = sphi %s934_s15, %s1195_s15   ;;  %s899_s14 = sphi %s932_s14, %s1194_s14   ;;  %s895_s13 = sphi %s930_s13, %s1193_s13   ;;  %s891_s12 = sphi %s928_s12, %s1192_s12  }
   0x4   : > { %s953_s18 = sadd.s32 1, %s903_s15   ;;  %s91_s19 = sadd.s32 1, %s899_s14 }
   0x5   : > { %s88_s20 = ssub.s32 %s903_s15, %s953_s18  ;;  %p101_p0 = scmp.ne.s32.totalorder %s899_s14, %s895_s13 }
   0x6   : > { %p89_p1 = scmp.eq.s32.totalorder %s88_s20, 0  ;;  %p102_p2 = scmp.eq.s32.totalorder %s949_s16, 1 }
   0x7   : > { %p107_p3 = scmp.ne.s32.totalorder %s895_s13, %s891_s12  ;;  %p108_p4 = scmp.eq.s32.totalorder %s650_s17, 1 }
   0x8   : > { %s964_s21 = scalar_select %p89_p1, %s899_s14, %s91_s19  }
   0x9   : > { %p966_p5 = por %p102_p2, %p101_p0  ;;  %p970_p6 = por %p108_p4, %p107_p3 }
   0xa   : > { %p653_p7 = scmp.ge.s32.totalorder %s903_s15, 1  ;;  %p141_p8 = scmp.lt.s32.totalorder %s903_s15, 3 }
   0xc   : > { %p142_p9 = pnand %p653_p7, %p141_p8 }
   0xd   : > { %s655_s28 = sshll.u32 (!%p142_p9), %s949_s16, 5  ;;  %s162_s17 = sand.u32 (!%p142_p9), 1, %s895_s13  }
   0xe   : > { %145 = sbr.rel (%p142_p9) target bundleno = 270 (0x10e), region = 32  ;;  %p166_p10 = scmp.lt.s32.totalorder (!%p142_p9), %s655_s28, 63 }
   0xf   : > { %s654_s19 = sshll.u32 (!%p142_p9), %s162_s17, 8  ;;  %s696_s26 = sshll.u32 (!%p142_p9), %s949_s16, 12 }
  0x10   : > { %s1071_s25 = scalar_lea.vmem (!%p142_p9), [#allocation2], %s654_s19  ;;  %s1134_s30 = scalar_lea.hbm (!%p142_p9), %s1189_s3, %s696_s26 }
  0x11   : > { %s588_s27 = sshll.u32 (!%p142_p9), %s1071_s25, 4  ;;  %s1146_s16 = scalar_lea.sflag (!%p142_p9), [#allocation3], %s162_s17  ;;  %s1136_s27 = int_to_ptr.vmem [resolvable:$true] %s588_s27 }
  0x12   : > { %s843_s4 = scalar_lea.vmem (!%p142_p9), %s1136_s27, 4096  ;;  %s905_s5 = smov (!%p142_p9), [#allocation2]  }
  0x13   : > { %v208_v0 = vld [vmem:[%s1187_s1 + $0x20] sm:$0xf]  ;;  %vm313_vm0 = vcmask 1043456   ;;  %v207_v1 = vld [vmem:[%s1187_s1 + $0x18] sm:$0xff]  ;;  %v206_v2 = vld [vmem:[%s1187_s1 + $0x10] sm:$0xff]  ;;  %s1197_s28 = smov (!%p166_p10, %s655_s28), 63  ;;  %p844_p11 = scmp.ne.s32.totalorder %s1136_s27, %s843_s4 }
  0x14   : > { %734 = vmatprep.subr.msk.mxu0 %vm313_vm0, %v208_v0  ;;  %792 = vmatprep.subr.msk.mxu1 %vm313_vm0, %v208_v0  ;;  %v205_v3 = vld [vmem:[%s1187_s1 + $0x8] sm:$0xff]  ;;  %s656_s6 = sshll.u32 %s1197_s28, 3  ;;  %v204_v4 = vld [vmem:[%s1187_s1] sm:$0xff]  ;;  %vm216_vm1 = vcmask 293888  }
  0x15   : > { %735 = vmatpush3.msk.msra.mxu0 %vm313_vm0, %v208_v0  ;;  %797 = vmatpush3.msk.msra.mxu1 %vm313_vm0, %v208_v0  ;;  %s995_s11 = scalar_lea.vmem %s1186_s0, %s656_s6  ;;  %v1067_v37 = vld [vmem:[%s1188_s2] ss:$0 sm:$0xff]  ;;  %p845_p12 = pnand %p844_p11, %p966_p5 }
  0x16   : > { %736 = vmatprep.subr.mxu0 %v207_v1  ;;  %793 = vmatprep.subr.mxu1 %v207_v1  ;;  %v172_v5 = vld [vmem:[%s995_s11] sm:$0xff]  ;;  %v173_v7 = vld [vmem:[%s995_s11 + $0x8] sm:$0xff]  ;;  %v174_v9 = vld [vmem:[%s995_s11 + $0x10] sm:$0xff]  ;;  %s847_s6 = sshll.u32 %s905_s5, 4  ;;  %s848_s6 = int_to_ptr.vmem [resolvable:$false] %s847_s6 }
  0x17   : > { %737 = vmatpush3.msra.mxu0 %v207_v1  ;;  %798 = vmatpush3.msra.mxu1 %v207_v1  ;;  %v188_v6 = vld [vmem:[%s995_s11 + $0x80] sm:$0xff]  ;;  %v189_v8 = vld [vmem:[%s995_s11 + $0x88] sm:$0xff]  ;;  %v190_v10 = vld [vmem:[%s995_s11 + $0x90] sm:$0xff]  ;;  %p846_p13 = pneg %p845_p12  ;;  %s849_s7 = scalar_lea.vmem %s848_s6, 8192 }
  0x18   : > { %738 = vmatprep.subr.mxu0 %v206_v2  ;;  %794 = vmatprep.subr.mxu1 %v206_v2  ;;  %v175_v11 = vld [vmem:[%s995_s11 + $0x18] sm:$0xff]  ;;  %v176_v13 = vld [vmem:[%s995_s11 + $0x20] sm:$0xff]  ;;  %v177_v15 = vld [vmem:[%s995_s11 + $0x28] sm:$0xff]  ;;  %p850_p0 = scmp.lt.s32.totalorder %s1136_s27, %s848_s6  ;;  %p851_p1 = scmp.lt.s32.totalorder %s849_s7, %s843_s4 }
  0x19   : > { %739 = vmatpush3.msra.mxu0 %v206_v2  ;;  %799 = vmatpush3.msra.mxu1 %v206_v2  ;;  %v191_v12 = vld [vmem:[%s995_s11 + $0x98] sm:$0xff]  ;;  %v192_v14 = vld [vmem:[%s995_s11 + $0xa0] sm:$0xff]  ;;  %v193_v16 = vld [vmem:[%s995_s11 + $0xa8] sm:$0xff] }
  0x1a   : > { %740 = vmatprep.subr.mxu0 %v205_v3  ;;  %795 = vmatprep.subr.mxu1 %v205_v3  ;;  %v178_v17 = vld [vmem:[%s995_s11 + $0x30] sm:$0xff]  ;;  %v179_v19 = vld [vmem:[%s995_s11 + $0x38] sm:$0xff]  ;;  %v180_v21 = vld [vmem:[%s995_s11 + $0x40] sm:$0xff]  ;;  %p852_p2 = por %p851_p1, %p850_p0 }
  0x1b   : > { %741 = vmatpush3.msra.mxu0 %v205_v3  ;;  %800 = vmatpush3.msra.mxu1 %v205_v3  ;;  %v194_v18 = vld [vmem:[%s995_s11 + $0xb0] sm:$0xff]  ;;  %v195_v20 = vld [vmem:[%s995_s11 + $0xb8] sm:$0xff]  ;;  %v196_v22 = vld [vmem:[%s995_s11 + $0xc0] sm:$0xff] }
  0x1c   : > { %742 = vmatprep.subr.mxu0 %v204_v4  ;;  %796 = vmatprep.subr.mxu1 %v204_v4  ;;  %v181_v23 = vld [vmem:[%s995_s11 + $0x48] sm:$0xff]  ;;  %v182_v25 = vld [vmem:[%s995_s11 + $0x50] sm:$0xff]  ;;  %v183_v27 = vld [vmem:[%s995_s11 + $0x58] sm:$0xff]  ;;  %p853_p3 = pnand %p852_p2, %p846_p13 }
  0x1d   : > { %743 = vmatpush3.msra.mxu0 %v204_v4  ;;  %801 = vmatpush3.msra.mxu1 %v204_v4  ;;  %v197_v24 = vld [vmem:[%s995_s11 + $0xc8] sm:$0xff]  ;;  %v198_v26 = vld [vmem:[%s995_s11 + $0xd0] sm:$0xff]  ;;  %v199_v28 = vld [vmem:[%s995_s11 + $0xd8] sm:$0xff] }
  0x1e   : > { %744 = vmatprep.mubr.msk.f32.mxu0 %vm216_vm1, %v172_v5  ;;  %768 = vmatprep.mubr.msk.f32.mxu1 %vm216_vm1, %v188_v6  ;;  %v184_v29 = vld [vmem:[%s995_s11 + $0x60] sm:$0xff]  ;;  %v185_v31 = vld [vmem:[%s995_s11 + $0x68] sm:$0xff]  ;;  %v186_v33 = vld [vmem:[%s995_s11 + $0x70] sm:$0xff] }
  0x1f   : > { %745 = vmatmul.mubr.msk.f32.vlgmr.msra.gmra.mxu0 %vm216_vm1, %v173_v7  ;;  %769 = vmatmul.mubr.msk.f32.vlgmr.msra.gmra.mxu1 %vm216_vm1, %v189_v8  ;;  %v200_v30 = vld [vmem:[%s995_s11 + $0xe0] sm:$0xff]  ;;  %v201_v32 = vld [vmem:[%s995_s11 + $0xe8] sm:$0xff]  ;;  %v202_v34 = vld [vmem:[%s995_s11 + $0xf0] sm:$0xff] }
  0x20   : > { %747 = vmatprep.mubr.msk.f32.mxu0 %vm216_vm1, %v174_v9  ;;  %771 = vmatprep.mubr.msk.f32.mxu1 %vm216_vm1, %v190_v10  ;;  %v187_v35 = vld [vmem:[%s995_s11 + $0x78] sm:$0xff] }
  0x21   : > { %v203_v36 = vld [vmem:[%s995_s11 + $0xf8] sm:$0xff] }
  0x23   : > { %748 = vmatmul.mubr.msk.f32.gmra.mxu0 %vm216_vm1, %v175_v11  ;;  %772 = vmatmul.mubr.msk.f32.gmra.mxu1 %vm216_vm1, %v191_v12 }
  0x24   : > { %750 = vmatprep.mubr.msk.f32.mxu0 %vm216_vm1, %v176_v13  ;;  %774 = vmatprep.mubr.msk.f32.mxu1 %vm216_vm1, %v192_v14 }
  0x27   : > { %751 = vmatmul.mubr.msk.f32.gmra.mxu0 %vm216_vm1, %v177_v15  ;;  %775 = vmatmul.mubr.msk.f32.gmra.mxu1 %vm216_vm1, %v193_v16 }
  0x28   : > { %753 = vmatprep.mubr.msk.f32.mxu0 %vm216_vm1, %v178_v17  ;;  %777 = vmatprep.mubr.msk.f32.mxu1 %vm216_vm1, %v194_v18 }
  0x2b   : > { %754 = vmatmul.mubr.msk.f32.gmra.mxu0 %vm216_vm1, %v179_v19  ;;  %778 = vmatmul.mubr.msk.f32.gmra.mxu1 %vm216_vm1, %v195_v20 }
  0x2c   : > { %756 = vmatprep.mubr.msk.f32.mxu0 %vm216_vm1, %v180_v21  ;;  %780 = vmatprep.mubr.msk.f32.mxu1 %vm216_vm1, %v196_v22 }
  0x2f   : > { %757 = vmatmul.mubr.msk.f32.gmra.mxu0 %vm216_vm1, %v181_v23  ;;  %781 = vmatmul.mubr.msk.f32.gmra.mxu1 %vm216_vm1, %v197_v24 }
  0x30   : > { %759 = vmatprep.mubr.msk.f32.mxu0 %vm216_vm1, %v182_v25  ;;  %783 = vmatprep.mubr.msk.f32.mxu1 %vm216_vm1, %v198_v26 }
  0x33   : > { %760 = vmatmul.mubr.msk.f32.gmra.mxu0 %vm216_vm1, %v183_v27  ;;  %784 = vmatmul.mubr.msk.f32.gmra.mxu1 %vm216_vm1, %v199_v28 }
  0x34   : > { %762 = vmatprep.mubr.msk.f32.mxu0 %vm216_vm1, %v184_v29  ;;  %786 = vmatprep.mubr.msk.f32.mxu1 %vm216_vm1, %v200_v30 }
  0x37   : > { %763 = vmatmul.mubr.msk.f32.gmra.mxu0 %vm216_vm1, %v185_v31  ;;  %787 = vmatmul.mubr.msk.f32.gmra.mxu1 %vm216_vm1, %v201_v32 }
  0x38   : > { %765 = vmatprep.mubr.msk.f32.mxu0 %vm216_vm1, %v186_v33  ;;  %789 = vmatprep.mubr.msk.f32.mxu1 %vm216_vm1, %v202_v34 }
  0x3b   : > { %766 = vmatmul.mubr.msk.f32.gmra.mxu0 %vm216_vm1, %v187_v35  ;;  %790 = vmatmul.mubr.msk.f32.gmra.mxu1 %vm216_vm1, %v203_v36 }
  0xdf   : > { %v746_v38 = vpop.f32.mrf.mxu0  ;;  %v770_v39 = vpop.f32.mrf.mxu1 }
  0xe0   : > { %v389_v40 = vadd.f32 %v746_v38, %v1067_v37  ;;  %v469_v41 = vadd.f32 %v770_v39, %v1067_v37 }
  0xe1   : > { %v383_v42 = vpop.f32.mrf.mxu0  ;;  %v463_v43 = vpop.f32.mrf.mxu1 }
  0xe2   : > { %543 = vst [vmem:[%s1071_s25 + $0x8] sm:$0xff] %v389_v40  ;;  %559 = vst [vmem:[%s1071_s25 + $0x88] sm:$0xff] %v469_v41  ;;  %v384_v44 = vadd.f32 %v1067_v37, %v383_v42  ;;  %v464_v45 = vadd.f32 %v1067_v37, %v463_v43 }
  0xe3   : > { %v749_v46 = vpop.f32.mrf.mxu0  ;;  %v773_v47 = vpop.f32.mrf.mxu1 }
  0xe4   : > { %542 = vst [vmem:[%s1071_s25] sm:$0xff] %v384_v44  ;;  %558 = vst [vmem:[%s1071_s25 + $0x80] sm:$0xff] %v464_v45  ;;  %v399_v48 = vadd.f32 %v749_v46, %v1067_v37  ;;  %v479_v49 = vadd.f32 %v773_v47, %v1067_v37 }
  0xe5   : > { %v393_v50 = vpop.f32.mrf.mxu0  ;;  %v473_v51 = vpop.f32.mrf.mxu1 }
  0xe6   : > { %545 = vst [vmem:[%s1071_s25 + $0x18] sm:$0xff] %v399_v48  ;;  %561 = vst [vmem:[%s1071_s25 + $0x98] sm:$0xff] %v479_v49  ;;  %v394_v52 = vadd.f32 %v1067_v37, %v393_v50  ;;  %v474_v53 = vadd.f32 %v1067_v37, %v473_v51 }
  0xe7   : > { %v752_v54 = vpop.f32.mrf.mxu0  ;;  %v776_v55 = vpop.f32.mrf.mxu1 }
  0xe8   : > { %544 = vst [vmem:[%s1071_s25 + $0x10] sm:$0xff] %v394_v52  ;;  %560 = vst [vmem:[%s1071_s25 + $0x90] sm:$0xff] %v474_v53  ;;  %v409_v56 = vadd.f32 %v752_v54, %v1067_v37  ;;  %v489_v57 = vadd.f32 %v776_v55, %v1067_v37 }
  0xe9   : > { %v403_v58 = vpop.f32.mrf.mxu0  ;;  %v483_v59 = vpop.f32.mrf.mxu1 }
  0xea   : > { %547 = vst [vmem:[%s1071_s25 + $0x28] sm:$0xff] %v409_v56  ;;  %563 = vst [vmem:[%s1071_s25 + $0xa8] sm:$0xff] %v489_v57  ;;  %v404_v60 = vadd.f32 %v1067_v37, %v403_v58  ;;  %v484_v61 = vadd.f32 %v1067_v37, %v483_v59 }
  0xeb   : > { %v755_v62 = vpop.f32.mrf.mxu0  ;;  %v779_v63 = vpop.f32.mrf.mxu1 }
  0xec   : > { %546 = vst [vmem:[%s1071_s25 + $0x20] sm:$0xff] %v404_v60  ;;  %562 = vst [vmem:[%s1071_s25 + $0xa0] sm:$0xff] %v484_v61  ;;  %v419_v0 = vadd.f32 %v755_v62, %v1067_v37  ;;  %v499_v1 = vadd.f32 %v779_v63, %v1067_v37 }
  0xed   : > { %v413_v2 = vpop.f32.mrf.mxu0  ;;  %v493_v3 = vpop.f32.mrf.mxu1 }
  0xee   : > { %549 = vst [vmem:[%s1071_s25 + $0x38] sm:$0xff] %v419_v0  ;;  %565 = vst [vmem:[%s1071_s25 + $0xb8] sm:$0xff] %v499_v1  ;;  %v414_v4 = vadd.f32 %v1067_v37, %v413_v2  ;;  %v494_v5 = vadd.f32 %v1067_v37, %v493_v3 }
  0xef   : > { %v758_v6 = vpop.f32.mrf.mxu0  ;;  %v782_v7 = vpop.f32.mrf.mxu1 }
  0xf0   : > { %548 = vst [vmem:[%s1071_s25 + $0x30] sm:$0xff] %v414_v4  ;;  %564 = vst [vmem:[%s1071_s25 + $0xb0] sm:$0xff] %v494_v5  ;;  %v429_v8 = vadd.f32 %v758_v6, %v1067_v37  ;;  %v509_v9 = vadd.f32 %v782_v7, %v1067_v37 }
  0xf1   : > { %v423_v10 = vpop.f32.mrf.mxu0  ;;  %v503_v11 = vpop.f32.mrf.mxu1 }
  0xf2   : > { %551 = vst [vmem:[%s1071_s25 + $0x48] sm:$0xff] %v429_v8  ;;  %567 = vst [vmem:[%s1071_s25 + $0xc8] sm:$0xff] %v509_v9  ;;  %v424_v12 = vadd.f32 %v1067_v37, %v423_v10  ;;  %v504_v13 = vadd.f32 %v1067_v37, %v503_v11 }
  0xf3   : > { %v761_v14 = vpop.f32.mrf.mxu0  ;;  %v785_v15 = vpop.f32.mrf.mxu1 }
  0xf4   : > { %550 = vst [vmem:[%s1071_s25 + $0x40] sm:$0xff] %v424_v12  ;;  %566 = vst [vmem:[%s1071_s25 + $0xc0] sm:$0xff] %v504_v13  ;;  %v439_v16 = vadd.f32 %v761_v14, %v1067_v37  ;;  %v519_v17 = vadd.f32 %v785_v15, %v1067_v37 }
  0xf5   : > { %v433_v18 = vpop.f32.mrf.mxu0  ;;  %v513_v19 = vpop.f32.mrf.mxu1 }
  0xf6   : > { %553 = vst [vmem:[%s1071_s25 + $0x58] sm:$0xff] %v439_v16  ;;  %569 = vst [vmem:[%s1071_s25 + $0xd8] sm:$0xff] %v519_v17  ;;  %v434_v20 = vadd.f32 %v1067_v37, %v433_v18  ;;  %v514_v21 = vadd.f32 %v1067_v37, %v513_v19 }
  0xf7   : > { %v764_v22 = vpop.f32.mrf.mxu0  ;;  %v788_v23 = vpop.f32.mrf.mxu1 }
  0xf8   : > { %552 = vst [vmem:[%s1071_s25 + $0x50] sm:$0xff] %v434_v20  ;;  %568 = vst [vmem:[%s1071_s25 + $0xd0] sm:$0xff] %v514_v21  ;;  %v449_v24 = vadd.f32 %v764_v22, %v1067_v37  ;;  %v529_v25 = vadd.f32 %v788_v23, %v1067_v37 }
  0xf9   : > { %v443_v26 = vpop.f32.mrf.mxu0  ;;  %v523_v27 = vpop.f32.mrf.mxu1 }
  0xfa   : > { %555 = vst [vmem:[%s1071_s25 + $0x68] sm:$0xff] %v449_v24  ;;  %571 = vst [vmem:[%s1071_s25 + $0xe8] sm:$0xff] %v529_v25  ;;  %v444_v28 = vadd.f32 %v1067_v37, %v443_v26  ;;  %v524_v29 = vadd.f32 %v1067_v37, %v523_v27 }
  0xfb   : > { %v767_v30 = vpop.f32.mrf.mxu0  ;;  %v791_v31 = vpop.f32.mrf.mxu1 }
  0xfc   : > { %554 = vst [vmem:[%s1071_s25 + $0x60] sm:$0xff] %v444_v28  ;;  %570 = vst [vmem:[%s1071_s25 + $0xe0] sm:$0xff] %v524_v29  ;;  %v459_v32 = vadd.f32 %v767_v30, %v1067_v37  ;;  %v539_v33 = vadd.f32 %v791_v31, %v1067_v37 }
  0xfd   : > { %v453_v34 = vpop.f32.mrf.mxu0  ;;  %v533_v35 = vpop.f32.mrf.mxu1 }
  0xfe   : > { %557 = vst [vmem:[%s1071_s25 + $0x78] sm:$0xff] %v459_v32  ;;  %573 = vst [vmem:[%s1071_s25 + $0xf8] sm:$0xff] %v539_v33  ;;  %v454_v36 = vadd.f32 %v1067_v37, %v453_v34  ;;  %v534_v38 = vadd.f32 %v1067_v37, %v533_v35 }
 0x100   : > { %556 = vst [vmem:[%s1071_s25 + $0x70] sm:$0xff] %v454_v36  ;;  %572 = vst [vmem:[%s1071_s25 + $0xf0] sm:$0xff] %v534_v38 }
 0x101   : > { %856 = shalt.err (!%p853_p3)
}
 0x102   : > { %s857_s8 = scalar_lea.hbm %s1134_s30, 4096  ;;  %s861_s11 = scalar_lea.hbm %s1189_s3, 8192 }
 0x103   : > { %p858_p4 = scmp.ne.s32.totalorder %s1134_s30, %s857_s8  ;;  %p862_p9 = scmp.lt.s32.totalorder %s1134_s30, %s1189_s3 }
 0x104   : > { %p863_p10 = scmp.lt.s32.totalorder %s861_s11, %s857_s8 }
 0x105   : > { %p859_p7 = pnand %p858_p4, %p966_p5 }
 0x106   : > { %p864_p11 = por %p863_p10, %p862_p9 }
 0x107   : > { %p860_p8 = pneg %p859_p7 }
 0x109   : > { %p865_p12 = pnand %p864_p11, %p860_p8 }
 0x10b   : > { %868 = shalt.err (!%p865_p12)
}
 0x10c   : > { %s906_s20 = smov 128   ;;  %s907_s24 = smov 8  }
 0x10d   : > { %802 = dma.vmem_to_hbm [thread:$0]  (%p966_p5), %s1136_s27, 4096, %s1134_s30, %s1146_s16, %s906_s20, %s906_s20, %s907_s24  }
 0x10e PF: > { %p808_p13 = scmp.ge.s32.totalorder %s903_s15, 2  ;;  %s603_s25 = sand.u32 1, %s891_s12  }
 0x10f   : > { %s604_s26 = scalar_lea.sflag [#allocation3], %s603_s25 }
 0x110   : > { %p805_p0 = pnand %p808_p13, %p970_p6 }
 0x112   : > { %p806_p1 = pneg %p805_p0 }
 0x114   : > { %886 = dma.done.wait (%p806_p1), %s604_s26, 4096  }
 0x115   : > { %888 = vsyncadd (%p806_p1), %s604_s26, 4294963200  ;;  %p13_p2 = scmp.ge.s32.totalorder %s953_s18, 4   ;;  %s1192_s12 = smov %s895_s13 }
 0x116   : > { %s1193_s13 = smov %s899_s14  ;;  %s1194_s14 = smov %s964_s21 }
 0x117   : > { %s1195_s15 = smov %s953_s18  ;;  %15 = sbr.rel (!%p13_p2) target bundleno = 3 (0x3), region = 67 }
 0x11c   :  { %609 = vsyncpa [#allocation3], 1 }
 0x11d   :  { %611 = vsyncpa [#allocation3 + $0x1], 1 }

</bundles_post_ra>
